<compile_context>
chip_gen: v6e
topology: v6e:2x2x1
jax: 0.10.0
libtpu: 0.0.40
codegen_flags: <defaults>
</compile_context>

<pallas_src>
import functools

import jax
import jax.numpy as jnp
from jax import lax
from jax.experimental import pallas as pl
from jax.experimental.pallas import tpu as pltpu


def _attention1d_kernel(x_ref, wqkv_ref, wo_ref, bo_ref,
                        out_ref, attn_ref,
                        q_scratch, k_scratch, v_scratch,
                        *, scale, heads, dim_head, q_tile):
    # x_ref:     (1, N, C)          full sequence for this batch row (bf16)
    # wqkv_ref:  (C, 3*H*Dh)        fused [Q | K | V] projection (bf16)
    # wo_ref:    (H*Dh, Do)         output projection (bf16)
    # bo_ref:    (1, Do)            output projection bias (f32)
    # out_ref:   (1, tq, Do)        output tile (f32)
    # attn_ref:  (1, H, tq, N)      attention probabilities tile (f32)
    # q_scratch: (N, H*Dh)  bf16    pre-scaled Q cache for the current batch row
    # k_scratch: (N, H*Dh)  bf16    K cache for the current batch row
    # v_scratch: (N, H*Dh)  bf16    V cache for the current batch row
    qi = pl.program_id(1)
    inner = heads * dim_head

    # QKV for the whole sequence: one wide matmul, computed once per batch row and
    # reused across all query tiles of that row.
    @pl.when(qi == 0)
    def _():
        qkv = jnp.dot(x_ref[0], wqkv_ref[...],
                      preferred_element_type=jnp.float32)            # (N, 3*inner) f32
        # Fold the 1/sqrt(Dh) scale into Q here, once per row.
        q_scratch[...] = (qkv[:, :inner] * scale).astype(q_scratch.dtype)
        k_scratch[...] = qkv[:, inner:2 * inner].astype(k_scratch.dtype)
        v_scratch[...] = qkv[:, 2 * inner:].astype(v_scratch.dtype)

    row0 = pl.multiple_of(qi * q_tile, q_tile)
    q_all = q_scratch[pl.ds(row0, q_tile), :]                         # (tq, inner) bf16
    k_all = k_scratch[...]                                            # (N, inner) bf16
    v_all = v_scratch[...]                                            # (N, inner) bf16

    o_heads = []
    for h in range(heads):                                            # static unroll (small H)
        lo = h * dim_head
        q_h = q_all[:, lo:lo + dim_head]                              # (tq, Dh)
        k_h = k_all[:, lo:lo + dim_head]                              # (N, Dh)
        v_h = v_all[:, lo:lo + dim_head]                              # (N, Dh)

        # q @ k^T without materializing a transpose of K.
        dots = lax.dot_general(q_h, k_h, (((1,), (1,)), ((), ())),
                               preferred_element_type=jnp.float32)    # (tq, N) f32

        # Numerically stable softmax, all in f32.
        dots = dots - jnp.max(dots, axis=-1, keepdims=True)
        e = jnp.exp(dots)
        attn_h = e * pl.reciprocal(jnp.sum(e, axis=-1, keepdims=True), approx=True)

        # NOTE: for small N this is a masked (non lane-dense) store; kept because the
        # module's contract is to return attn in (B, H, N, N) layout.
        attn_ref[0, h] = attn_h.astype(attn_ref.dtype)

        o_heads.append(jnp.dot(attn_h.astype(jnp.bfloat16), v_h,
                               preferred_element_type=jnp.float32))   # (tq, Dh) f32

    o = jnp.concatenate(o_heads, axis=-1).astype(jnp.bfloat16)        # (tq, inner) == 'b n (h d)'
    out = jnp.dot(o, wo_ref[...], preferred_element_type=jnp.float32) + bo_ref[...]
    out_ref[0] = out.astype(out_ref.dtype)


def attention1d(x, w_qkv, w_out, b_out, *, heads, dim_head, q_tile=128):
    """Forward pass of Attention1d.

    x:      (B, N, C) float32
    w_qkv:  (C, 3*heads*dim_head)   to_qkv weight in (in, out) layout, columns = [Q | K | V],
                                    each block head-major '(h d)' like the PyTorch module.
    w_out:  (heads*dim_head, Do)    to_out[0] weight in (in, out) layout
    b_out:  (Do,)                   to_out[0] bias
    returns (out, attn): out (B, N, Do) f32, attn (B, heads, N, N) f32
    """
    B, N, C = x.shape
    inner = heads * dim_head
    Do = w_out.shape[-1]
    scale = dim_head ** (-0.5)

    tq = min(q_tile, N)
    assert N % tq == 0, "sequence length must be divisible by the query tile"
    nq = N // tq

    # bf16 MXU operands; accumulation / softmax stay f32 inside the kernel.
    x_bf = x.astype(jnp.bfloat16)
    wqkv = w_qkv.astype(jnp.bfloat16)                     # (C, 3*inner) fused [Q | K | V]
    wo = w_out.astype(jnp.bfloat16)                       # (inner, Do)
    bo = b_out.reshape(1, Do).astype(jnp.float32)

    kernel = functools.partial(_attention1d_kernel, scale=scale, heads=heads,
                               dim_head=dim_head, q_tile=tq)

    out, attn = pl.pallas_call(
        kernel,
        out_shape=(
            jax.ShapeDtypeStruct((B, N, Do), jnp.float32),            # out
            jax.ShapeDtypeStruct((B, heads, N, N), jnp.float32),      # attn
        ),
        grid_spec=pltpu.PrefetchScalarGridSpec(
            num_scalar_prefetch=0,
            grid=(B, nq),
            in_specs=[
                pl.BlockSpec((1, N, C), lambda b, q: (b, 0, 0)),      # x (full row, kept resident)
                pl.BlockSpec((C, 3 * inner), lambda b, q: (0, 0)),    # fused qkv weight
                pl.BlockSpec((inner, Do), lambda b, q: (0, 0)),       # wo
                pl.BlockSpec((1, Do), lambda b, q: (0, 0)),           # bo
            ],
            out_specs=(
                pl.BlockSpec((1, tq, Do), lambda b, q: (b, q, 0)),            # out tile
                pl.BlockSpec((1, heads, tq, N), lambda b, q: (b, 0, q, 0)),   # attn tile
            ),
            scratch_shapes=[
                pltpu.VMEM((N, inner), jnp.bfloat16),    # Q cache (pre-scaled, per batch row)
                pltpu.VMEM((N, inner), jnp.bfloat16),    # K cache (per batch row)
                pltpu.VMEM((N, inner), jnp.bfloat16),    # V cache (per batch row)
            ],
        ),
        compiler_params=pltpu.CompilerParams(
            # q-tile axis is "arbitrary": the Q/K/V scratch computed at qi==0 is reused
            # by later q tiles of the same batch row.  Batch is megacore-parallel.
            dimension_semantics=("parallel", "arbitrary"),
        ),
    )(x_bf, wqkv, wo, bo)
    return out, attn


def reference(x, w_qkv, w_out, b_out, *, heads, dim_head):
    """Plain-JAX f32 reference mirroring the PyTorch module."""
    B, N, C = x.shape
    inner = heads * dim_head
    scale = dim_head ** (-0.5)
    qkv = x @ w_qkv                                         # (B, N, 3*inner)
    q, k, v = jnp.split(qkv, 3, axis=-1)

    def split_heads(t):                                     # 'b n (h d) -> b h n d'
        return t.reshape(B, N, heads, dim_head).transpose(0, 2, 1, 3)

    q, k, v = map(split_heads, (q, k, v))
    dots = jnp.einsum("bhid,bhjd->bhij", q, k) * scale
    attn = jax.nn.softmax(dots, axis=-1)
    o = jnp.einsum("bhij,bhjd->bhid", attn, v)
    o = o.transpose(0, 2, 1, 3).reshape(B, N, inner)        # 'b h n d -> b n (h d)'
    out = o @ w_out + b_out
    return out, attn


if __name__ == "__main__":
    # Small shapes consistent with the module: dim_in=32, heads=2, dim_head=16,
    # dim_out defaults to dim_in.
    B, N, C = 2, 8, 32
    heads, dim_head = 2, 16
    inner = heads * dim_head
    dim_out = C

    key = jax.random.PRNGKey(0)
    kx, kqkv, kwo, kbo = jax.random.split(key, 4)

    x = jax.random.normal(kx, (B, N, C), dtype=jnp.float32)
    # to_qkv: Linear(C, 3*inner, bias=False), weight in (in, out) layout, cols = [Q | K | V].
    w_qkv = jax.random.normal(kqkv, (C, 3 * inner), dtype=jnp.float32) * 0.05
    # to_out: Linear(inner, dim_out) with bias (dropout=0.0 -> Identity).
    w_out = jax.random.normal(kwo, (inner, dim_out), dtype=jnp.float32) * 0.05
    b_out = jax.random.normal(kbo, (dim_out,), dtype=jnp.float32) * 0.05

    out, attn = attention1d(x, w_qkv, w_out, b_out, heads=heads, dim_head=dim_head)
    out = jax.block_until_ready(out)
    attn = jax.block_until_ready(attn)

    out_ref, attn_ref = reference(x, w_qkv, w_out, b_out, heads=heads, dim_head=dim_head)

    assert out.shape == (B, N, dim_out) and attn.shape == (B, heads, N, N)
    # bf16 MXU operands + approx reciprocal -> compare against the f32 reference
    # with a correspondingly relaxed tolerance.
    assert jnp.allclose(out, out_ref, atol=2e-2, rtol=2e-2), float(jnp.max(jnp.abs(out - out_ref)))
    assert jnp.allclose(attn, attn_ref, atol=2e-2, rtol=2e-2), float(jnp.max(jnp.abs(attn - attn_ref)))

    print("KERNEL_OK")
</pallas_src>

<mosaic_0001>
module attributes {stable_mosaic.version = 11 : i64} {
  func.func @_attention1d_kernel(%arg0: i32, %arg1: i32, %arg2: memref<1x8x32xbf16, #tpu.memory_space<vmem>>, %arg3: memref<32x96xbf16, #tpu.memory_space<vmem>>, %arg4: memref<32x32xbf16, #tpu.memory_space<vmem>>, %arg5: memref<1x32xf32, #tpu.memory_space<vmem>>, %arg6: memref<1x8x32xf32, #tpu.memory_space<vmem>>, %arg7: memref<1x2x8x8xf32, #tpu.memory_space<vmem>>, %arg8: memref<8x32xbf16, #tpu.memory_space<vmem>>, %arg9: memref<8x32xbf16, #tpu.memory_space<vmem>>, %arg10: memref<8x32xbf16, #tpu.memory_space<vmem>>) attributes {dimension_semantics = [#tpu.dimension_semantics<parallel>, #tpu.dimension_semantics<arbitrary>], iteration_bounds = array<i64: 2, 1>, scalar_prefetch = 0 : i64, scratch_operands = 3 : i64, tpu.core_type = #tpu.core_type<tc>, window_params = [{transform_indices = @transform_0, window_bounds = array<i64: 1, 8, 32>}, {pipeline_mode = #tpu.pipeline_mode<synchronous>, transform_indices = @transform_1, window_bounds = array<i64: 32, 96>}, {pipeline_mode = #tpu.pipeline_mode<synchronous>, transform_indices = @transform_2, window_bounds = array<i64: 32, 32>}, {pipeline_mode = #tpu.pipeline_mode<synchronous>, transform_indices = @transform_3, window_bounds = array<i64: 1, 32>}, {transform_indices = @transform_4, window_bounds = array<i64: 1, 8, 32>}, {transform_indices = @transform_5, window_bounds = array<i64: 1, 2, 8, 8>}]} {
    %c0_i32 = arith.constant 0 : i32
    %0 = arith.cmpi eq, %arg1, %c0_i32 : i32
    %1 = arith.extui %0 : i1 to i32
    %c0_i32_0 = arith.constant 0 : i32
    %2 = arith.cmpi ne, %1, %c0_i32_0 : i32
    scf.if %2 {
      %c0_27 = arith.constant 0 : index
      %c0_28 = arith.constant 0 : index
      %c0_29 = arith.constant 0 : index
      %57 = vector.load %arg2[%c0_27, %c0_28, %c0_29] : memref<1x8x32xbf16, #tpu.memory_space<vmem>>, vector<1x8x32xbf16>
      %58 = vector.shape_cast %57 : vector<1x8x32xbf16> to vector<8x32xbf16>
      %c0_30 = arith.constant 0 : index
      %c0_31 = arith.constant 0 : index
      %59 = vector.load %arg3[%c0_30, %c0_31] : memref<32x96xbf16, #tpu.memory_space<vmem>>, vector<32x96xbf16>
      %cst_32 = arith.constant dense<0.000000e+00> : vector<8x96xf32>
      %60 = tpu.matmul %58, %59, %cst_32 {dimension_numbers = #tpu.dot_dimension_numbers<[1], [0], [0], [1], [0, 0, 1, 1], [], []>} : vector<8x32xbf16>, vector<32x96xbf16>, vector<8x96xf32> -> vector<8x96xf32>
      %61 = vector.extract_strided_slice %60 {offsets = [0, 0], sizes = [8, 32], strides = [1, 1]} : vector<8x96xf32> to vector<8x32xf32>
      %cst_33 = arith.constant 2.500000e-01 : f32
      %62 = vector.broadcast %cst_33 : f32 to vector<8x32xf32>
      %63 = arith.mulf %61, %62 : vector<8x32xf32>
      %64 = arith.truncf %63 : vector<8x32xf32> to vector<8x32xbf16>
      %c0_34 = arith.constant 0 : index
      %c0_35 = arith.constant 0 : index
      %65 = vector.load %arg8[%c0_34, %c0_35] : memref<8x32xbf16, #tpu.memory_space<vmem>>, vector<8x32xbf16>
      tpu.vector_store %arg8[%c0_34, %c0_35], %64 {strides = array<i32>} : memref<8x32xbf16, #tpu.memory_space<vmem>>, vector<8x32xbf16>,
      %66 = vector.extract_strided_slice %60 {offsets = [0, 32], sizes = [8, 32], strides = [1, 1]} : vector<8x96xf32> to vector<8x32xf32>
      %67 = arith.truncf %66 : vector<8x32xf32> to vector<8x32xbf16>
      %c0_36 = arith.constant 0 : index
      %c0_37 = arith.constant 0 : index
      %68 = vector.load %arg9[%c0_36, %c0_37] : memref<8x32xbf16, #tpu.memory_space<vmem>>, vector<8x32xbf16>
      tpu.vector_store %arg9[%c0_36, %c0_37], %67 {strides = array<i32>} : memref<8x32xbf16, #tpu.memory_space<vmem>>, vector<8x32xbf16>,
      %69 = vector.extract_strided_slice %60 {offsets = [0, 64], sizes = [8, 32], strides = [1, 1]} : vector<8x96xf32> to vector<8x32xf32>
      %70 = arith.truncf %69 : vector<8x32xf32> to vector<8x32xbf16>
      %c0_38 = arith.constant 0 : index
      %c0_39 = arith.constant 0 : index
      %71 = vector.load %arg10[%c0_38, %c0_39] : memref<8x32xbf16, #tpu.memory_space<vmem>>, vector<8x32xbf16>
      tpu.vector_store %arg10[%c0_38, %c0_39], %70 {strides = array<i32>} : memref<8x32xbf16, #tpu.memory_space<vmem>>, vector<8x32xbf16>,
    } else {
    }
    %c8_i32 = arith.constant 8 : i32
    %3 = arith.muli %arg1, %c8_i32 : i32
    %4 = tpu.assume_multiple %3, 8 : i32
    %5 = arith.index_cast %4 : i32 to index
    %c0 = arith.constant 0 : index
    %6 = vector.load %arg8[%5, %c0] : memref<8x32xbf16, #tpu.memory_space<vmem>>, vector<8x32xbf16>
    %c0_1 = arith.constant 0 : index
    %c0_2 = arith.constant 0 : index
    %7 = vector.load %arg9[%c0_1, %c0_2] : memref<8x32xbf16, #tpu.memory_space<vmem>>, vector<8x32xbf16>
    %c0_3 = arith.constant 0 : index
    %c0_4 = arith.constant 0 : index
    %8 = vector.load %arg10[%c0_3, %c0_4] : memref<8x32xbf16, #tpu.memory_space<vmem>>, vector<8x32xbf16>
    %9 = vector.extract_strided_slice %6 {offsets = [0, 0], sizes = [8, 16], strides = [1, 1]} : vector<8x32xbf16> to vector<8x16xbf16>
    %10 = vector.extract_strided_slice %7 {offsets = [0, 0], sizes = [8, 16], strides = [1, 1]} : vector<8x32xbf16> to vector<8x16xbf16>
    %11 = vector.extract_strided_slice %8 {offsets = [0, 0], sizes = [8, 16], strides = [1, 1]} : vector<8x32xbf16> to vector<8x16xbf16>
    %cst = arith.constant dense<0.000000e+00> : vector<8x8xf32>
    %12 = tpu.matmul %9, %10, %cst {dimension_numbers = #tpu.dot_dimension_numbers<[1], [1], [0], [0], [0, 0, 1, 0], [], []>} : vector<8x16xbf16>, vector<8x16xbf16>, vector<8x8xf32> -> vector<8x8xf32>
    %cst_5 = arith.constant dense<0xFF800000> : vector<8xf32>
    %13 = vector.multi_reduction <maximumf>, %12, %cst_5 [1] : vector<8x8xf32> to vector<8xf32>
    %14 = vector.shape_cast %13 : vector<8xf32> to vector<8x1xf32>
    %15 = vector.broadcast %14 : vector<8x1xf32> to vector<8x8xf32>
    %16 = arith.subf %12, %15 : vector<8x8xf32>
    %17 = math.exp %16 : vector<8x8xf32>
    %cst_6 = arith.constant dense<0.000000e+00> : vector<8xf32>
    %18 = vector.multi_reduction <add>, %17, %cst_6 [1] : vector<8x8xf32> to vector<8xf32>
    %19 = vector.shape_cast %18 : vector<8xf32> to vector<8x1xf32>
    %20 = tpu.reciprocal %19 {approx = true} : vector<8x1xf32> -> vector<8x1xf32>
    %21 = vector.broadcast %20 : vector<8x1xf32> to vector<8x8xf32>
    %22 = arith.mulf %17, %21 : vector<8x8xf32>
    %c0_7 = arith.constant 0 : index
    %c0_8 = arith.constant 0 : index
    %c0_9 = arith.constant 0 : index
    %c0_10 = arith.constant 0 : index
    %23 = vector.load %arg7[%c0_7, %c0_8, %c0_9, %c0_10] : memref<1x2x8x8xf32, #tpu.memory_space<vmem>>, vector<1x1x8x8xf32>
    %24 = vector.shape_cast %23 : vector<1x1x8x8xf32> to vector<8x8xf32>
    %25 = vector.shape_cast %22 : vector<8x8xf32> to vector<1x1x8x8xf32>
    tpu.vector_store %arg7[%c0_7, %c0_8, %c0_9, %c0_10], %25 {strides = array<i32>} : memref<1x2x8x8xf32, #tpu.memory_space<vmem>>, vector<1x1x8x8xf32>,
    %26 = arith.truncf %22 : vector<8x8xf32> to vector<8x8xbf16>
    %cst_11 = arith.constant dense<0.000000e+00> : vector<8x16xf32>
    %27 = tpu.matmul %26, %11, %cst_11 {dimension_numbers = #tpu.dot_dimension_numbers<[1], [0], [0], [1], [0, 0, 1, 1], [], []>} : vector<8x8xbf16>, vector<8x16xbf16>, vector<8x16xf32> -> vector<8x16xf32>
    %28 = vector.extract_strided_slice %6 {offsets = [0, 16], sizes = [8, 16], strides = [1, 1]} : vector<8x32xbf16> to vector<8x16xbf16>
    %29 = vector.extract_strided_slice %7 {offsets = [0, 16], sizes = [8, 16], strides = [1, 1]} : vector<8x32xbf16> to vector<8x16xbf16>
    %30 = vector.extract_strided_slice %8 {offsets = [0, 16], sizes = [8, 16], strides = [1, 1]} : vector<8x32xbf16> to vector<8x16xbf16>
    %cst_12 = arith.constant dense<0.000000e+00> : vector<8x8xf32>
    %31 = tpu.matmul %28, %29, %cst_12 {dimension_numbers = #tpu.dot_dimension_numbers<[1], [1], [0], [0], [0, 0, 1, 0], [], []>} : vector<8x16xbf16>, vector<8x16xbf16>, vector<8x8xf32> -> vector<8x8xf32>
    %cst_13 = arith.constant dense<0xFF800000> : vector<8xf32>
    %32 = vector.multi_reduction <maximumf>, %31, %cst_13 [1] : vector<8x8xf32> to vector<8xf32>
    %33 = vector.shape_cast %32 : vector<8xf32> to vector<8x1xf32>
    %34 = vector.broadcast %33 : vector<8x1xf32> to vector<8x8xf32>
    %35 = arith.subf %31, %34 : vector<8x8xf32>
    %36 = math.exp %35 : vector<8x8xf32>
    %cst_14 = arith.constant dense<0.000000e+00> : vector<8xf32>
    %37 = vector.multi_reduction <add>, %36, %cst_14 [1] : vector<8x8xf32> to vector<8xf32>
    %38 = vector.shape_cast %37 : vector<8xf32> to vector<8x1xf32>
    %39 = tpu.reciprocal %38 {approx = true} : vector<8x1xf32> -> vector<8x1xf32>
    %40 = vector.broadcast %39 : vector<8x1xf32> to vector<8x8xf32>
    %41 = arith.mulf %36, %40 : vector<8x8xf32>
    %c0_15 = arith.constant 0 : index
    %c1 = arith.constant 1 : index
    %c0_16 = arith.constant 0 : index
    %c0_17 = arith.constant 0 : index
    %42 = vector.load %arg7[%c0_15, %c1, %c0_16, %c0_17] : memref<1x2x8x8xf32, #tpu.memory_space<vmem>>, vector<1x1x8x8xf32>
    %43 = vector.shape_cast %42 : vector<1x1x8x8xf32> to vector<8x8xf32>
    %44 = vector.shape_cast %41 : vector<8x8xf32> to vector<1x1x8x8xf32>
    tpu.vector_store %arg7[%c0_15, %c1, %c0_16, %c0_17], %44 {strides = array<i32>} : memref<1x2x8x8xf32, #tpu.memory_space<vmem>>, vector<1x1x8x8xf32>,
    %45 = arith.truncf %41 : vector<8x8xf32> to vector<8x8xbf16>
    %cst_18 = arith.constant dense<0.000000e+00> : vector<8x16xf32>
    %46 = tpu.matmul %45, %30, %cst_18 {dimension_numbers = #tpu.dot_dimension_numbers<[1], [0], [0], [1], [0, 0, 1, 1], [], []>} : vector<8x8xbf16>, vector<8x16xbf16>, vector<8x16xf32> -> vector<8x16xf32>
    %47 = tpu.concatenate %27, %46 in 1 : vector<8x16xf32>, vector<8x16xf32> -> vector<8x32xf32>
    %48 = arith.truncf %47 : vector<8x32xf32> to vector<8x32xbf16>
    %c0_19 = arith.constant 0 : index
    %c0_20 = arith.constant 0 : index
    %49 = vector.load %arg4[%c0_19, %c0_20] : memref<32x32xbf16, #tpu.memory_space<vmem>>, vector<32x32xbf16>
    %cst_21 = arith.constant dense<0.000000e+00> : vector<8x32xf32>
    %50 = tpu.matmul %48, %49, %cst_21 {dimension_numbers = #tpu.dot_dimension_numbers<[1], [0], [0], [1], [0, 0, 1, 1], [], []>} : vector<8x32xbf16>, vector<32x32xbf16>, vector<8x32xf32> -> vector<8x32xf32>
    %c0_22 = arith.constant 0 : index
    %c0_23 = arith.constant 0 : index
    %51 = vector.load %arg5[%c0_22, %c0_23] : memref<1x32xf32, #tpu.memory_space<vmem>>, vector<1x32xf32>
    %52 = vector.broadcast %51 : vector<1x32xf32> to vector<8x32xf32>
    %53 = arith.addf %50, %52 : vector<8x32xf32>
    %c0_24 = arith.constant 0 : index
    %c0_25 = arith.constant 0 : index
    %c0_26 = arith.constant 0 : index
    %54 = vector.load %arg6[%c0_24, %c0_25, %c0_26] : memref<1x8x32xf32, #tpu.memory_space<vmem>>, vector<1x8x32xf32>
    %55 = vector.shape_cast %54 : vector<1x8x32xf32> to vector<8x32xf32>
    %56 = vector.shape_cast %53 : vector<8x32xf32> to vector<1x8x32xf32>
    tpu.vector_store %arg6[%c0_24, %c0_25, %c0_26], %56 {strides = array<i32>} : memref<1x8x32xf32, #tpu.memory_space<vmem>>, vector<1x8x32xf32>,
    return
  }
  func.func @transform_0(%arg0: i32, %arg1: i32) -> (i32, i32, i32) {
    %c0_i32 = arith.constant 0 : i32
    %c0_i32_0 = arith.constant 0 : i32
    %c0_i32_1 = arith.constant 0 : i32
    return %arg0, %c0_i32, %c0_i32_0 : i32, i32, i32
  }
  func.func @transform_1(%arg0: i32, %arg1: i32) -> (i32, i32) {
    %c0_i32 = arith.constant 0 : i32
    %c0_i32_0 = arith.constant 0 : i32
    %c0_i32_1 = arith.constant 0 : i32
    return %c0_i32, %c0_i32_0 : i32, i32
  }
  func.func @transform_2(%arg0: i32, %arg1: i32) -> (i32, i32) {
    %c0_i32 = arith.constant 0 : i32
    %c0_i32_0 = arith.constant 0 : i32
    %c0_i32_1 = arith.constant 0 : i32
    return %c0_i32, %c0_i32_0 : i32, i32
  }
  func.func @transform_3(%arg0: i32, %arg1: i32) -> (i32, i32) {
    %c0_i32 = arith.constant 0 : i32
    %c0_i32_0 = arith.constant 0 : i32
    %c0_i32_1 = arith.constant 0 : i32
    return %c0_i32, %c0_i32_0 : i32, i32
  }
  func.func @transform_4(%arg0: i32, %arg1: i32) -> (i32, i32, i32) {
    %c0_i32 = arith.constant 0 : i32
    %c0_i32_0 = arith.constant 0 : i32
    return %arg0, %arg1, %c0_i32 : i32, i32, i32
  }
  func.func @transform_5(%arg0: i32, %arg1: i32) -> (i32, i32, i32, i32) {
    %c0_i32 = arith.constant 0 : i32
    %c0_i32_0 = arith.constant 0 : i32
    %c0_i32_1 = arith.constant 0 : i32
    return %arg0, %c0_i32, %arg1, %c0_i32_0 : i32, i32, i32, i32
  }
}

</mosaic_0001>

<bundles_post_ra>
// kernel: tpu_custom_call.1
= control target key start
LH: loop header
LB: loop body
LE: loop exit
PB: predicated region body
PF: predicated region fallthrough
CT: control target
= control target key end

     0   :  { %s1578_s0 = inlined_call_operand.hbm [shape: bf16[2,8,32], index: 0, kind: input, shape index: {}]   ;;  %s1579_s1 = inlined_call_operand.hbm [shape: bf16[32,96], index: 1, kind: input, shape index: {}]   ;;  %s1580_s2 = inlined_call_operand.hbm [shape: bf16[32,32], index: 2, kind: input, shape index: {}]   ;;  %s1581_s3 = inlined_call_operand.vmem [shape: f32[1,32], index: 3, kind: input, shape index: {}]   ;;  %s1582_s4 = inlined_call_operand.hbm [shape: f32[2,8,32], index: 4, kind: output, shape index: {0}]   ;;  %s1583_s5 = inlined_call_operand.hbm [shape: f32[2,2,8,8], index: 5, kind: output, shape index: {1}]  }
   0x1   :  { %1587 = sst [smem:[#allocation18_spill]] %s1579_s1 }
   0x2   :  { %11 = vsyncpa [#allocation6], 0 }
   0x3   :  { %13 = vsyncpa [#allocation6 + $0x1], 0 }
   0x4   :  { %14 = vsyncpa [#allocation9], 0 }
   0x5   :  { %15 = vsyncpa [#allocation7], 0 }
   0x6   :  { %17 = vsyncpa [#allocation7 + $0x1], 0 }
   0x7   :  { %18 = vsyncpa [#allocation13], 0 }
   0x8   :  { %20 = vsyncpa [#allocation13 + $0x1], 0  ;;  %s1307_s18 = smov 0   ;;  %s1309_s19 = smov 0  }
   0x9   :  { %s1311_s20 = smov 0   ;;  %s1313_s21 = smov 0  }
   0xa   :  { %s1315_s22 = smov 0   ;;  %s1317_s23 = smov 0  }
   0xb LB: > { %s860_s24 = sadd.s32 4294967295, %s1260_s23   ;;  %s861_s25 = sadd.s32 4294967294, %s1260_s23   ;;  %s1260_s23 = sphi %s1317_s23, %s26_s23   ;;  %s1256_s22 = sphi %s1315_s22, %s1605_s22   ;;  %s1252_s21 = sphi %s1313_s21, %s1604_s21   ;;  %s1248_s20 = sphi %s1311_s20, %s1603_s20   ;;  %s1244_s19 = sphi %s1309_s19, %s1602_s19   ;;  %s1240_s18 = sphi %s1307_s18, %s1601_s18  }
   0xc   : > { %p58_p0 = scmp.ne.s32.totalorder %s1244_s19, %s1240_s18  ;;  %p1341_p1 = scmp.eq.s32.totalorder %s860_s24, 0 }
   0xd   : > { %p1345_p2 = scmp.eq.s32.totalorder %s860_s24, 1  ;;  %p153_p3 = scmp.eq.s32.totalorder %s861_s25, 1 }
   0xe   : > { %s1588_s26 = scalar_select %p1341_p1, 1, 0 }
   0xf   : > { %p1351_p4 = por %p1341_p1, %p58_p0  ;;  %p862_p5 = scmp.ge.s32.totalorder %s1260_s23, 1 }
  0x10   : > { %p1356_p6 = por %p153_p3, %p58_p0  ;;  %p188_p7 = scmp.lt.s32.totalorder %s1260_s23, 3 }
  0x11   : > { %s1590_s28 = scalar_select %p1351_p4, 1, 0 }
  0x12   : > { %s1591_s29 = scalar_select %p1356_p6, 1, 0 }
  0x13   : > { %p1361_p8 = pnand %p862_p5, %p188_p7  ;;  %s1262_s6 = smov [#allocation8]  }
  0x14   : > { %s200_s7 = sshll.u32 %s1262_s6, 4  ;;  %s1263_s9 = smov [#allocation10]   ;;  %s201_s7 = int_to_ptr.vmem [resolvable:$true] %s200_s7 }
  0x15   : > { %p967_p9 = pneg %p1361_p8  ;;  %s213_s10 = sshll.u32 %s1263_s9, 4  ;;  %s214_s10 = int_to_ptr.vmem [resolvable:$true] %s213_s10 }
  0x16   : > { %s1077_s11 = scalar_lea.vmem %s201_s7, 256  ;;  %p1085_p5 = scmp.lt.s32.totalorder %s201_s7, %s201_s7 }
  0x17   : > { %p1370_p11 = pnand %p967_p9, %p1341_p1  ;;  %p1078_p13 = scmp.ne.s32.totalorder %s201_s7, %s1077_s11 }
  0x18   : > { %p1086_p7 = scmp.lt.s32.totalorder %s1077_s11, %s1077_s11 }
  0x19   : > { %p1068_p12 = pneg %p1370_p11 }
  0x1a   : > { %p1087_p10 = por %p1086_p7, %p1085_p5 }
  0x1b   : > { %p1080_p0 = pnand %p1078_p13, %p1068_p12 }
  0x1d   : > { %p1081_p3 = pneg %p1080_p0 }
  0x1f   : > { %p1088_p9 = pnand %p1087_p10, %p1081_p3 }
  0x21   : > { %1091 = shalt.err (!%p1088_p9)
}
  0x22   : > { %s1264_s12 = smov 64   ;;  %s1265_s13 = smov 4  }
  0x23   : > { %s1594_s1 = sld [smem:[#allocation18_spill]]  ;;  %s1103_s16 = scalar_lea.vmem %s214_s10, 256 }
  0x24   : > { %p1104_p6 = scmp.ne.s32.totalorder %s214_s10, %s1103_s16  ;;  %p1111_p1 = scmp.lt.s32.totalorder %s214_s10, %s214_s10 }
  0x25   : > { %p1112_p4 = scmp.lt.s32.totalorder %s1103_s16, %s1103_s16 }
  0x26   : > { %p1106_p13 = pnand %p1104_p6, %p1068_p12 }
  0x27   : > { %p1113_p5 = por %p1112_p4, %p1111_p1 }
  0x28   : > { %p1107_p0 = pneg %p1106_p13 }
  0x29   : > { %970 = dma.hbm_to_vmem [thread:$0]  (!%p1370_p11), %s1594_s1, 256, %s201_s7, [#allocation9], %s1264_s12, %s1264_s12, %s1265_s13  }
  0x2a   : > { %p1114_p10 = pnand %p1113_p5, %p1107_p0 }
  0x2c   : > { %1117 = shalt.err (!%p1114_p10)
}
  0x2d   : > { %973 = dma.hbm_to_vmem [thread:$0]  (!%p1370_p11), %s1580_s2, 256, %s214_s10, [#allocation9], %s1264_s12, %s1264_s12, %s1265_s13  }
  0x2e   : > { %s38_s25 = sadd.s32 1, %s1256_s22  ;;  %s45_s6 = sadd.s32 1, %s1248_s20 }
  0x2f   : > { %p40_p1 = scmp.ge.s32.totalorder %s38_s25, 2  ;;  %p52_p4 = scmp.ne.s32.totalorder %s1248_s20, %s1244_s19 }
  0x30   : > { %p53_p6 = scmp.eq.s32.totalorder %s1260_s23, 0  ;;  %p987_p12 = scmp.lt.s32.totalorder %s1260_s23, 2 }
  0x31   : > { %s1607_s25 = smov (%p40_p1, %s38_s25), 0  ;;  %p1402_p7 = por %p1345_p2, %p52_p4 }
  0x32   : > { %p54_p3 = por %p53_p6, %p52_p4  ;;  %s42_s8 = ssub.s32 %s1256_s22, %s1607_s25 }
  0x33   : > { %s230_s9 = sand.u32 1, %s1248_s20   ;;  %p43_p9 = scmp.eq.s32.totalorder %s42_s8, 0 }
  0x34   : > { %s866_s10 = sshll.u32 %s230_s9, 2  ;;  %s867_s11 = sshll.u32 %s1256_s22, 6 }
  0x35   : > { %s1411_s12 = scalar_select %p43_p9, %s1248_s20, %s45_s6  }
  0x36   : > { %s239_s15 = scalar_lea.hbm %s1578_s0, %s867_s11  ;;  %s234_s16 = scalar_lea.vmem [#allocation5], %s866_s10 }
  0x37   : > { %s241_s17 = sshll.u32 %s234_s16, 4  ;;  %p1418_p11 = pnand %p987_p12, %p54_p3  ;;  %s242_s17 = int_to_ptr.vmem [resolvable:$true] %s241_s17 }
  0x38   : > { %s231_s24 = scalar_lea.sflag [#allocation6], %s230_s9  ;;  %s1131_s8 = scalar_lea.vmem %s242_s17, 64 }
  0x39   : > { %p1120_p2 = pneg %p1418_p11  ;;  %p1132_p13 = scmp.ne.s32.totalorder %s242_s17, %s1131_s8 }
  0x3a   : > { %s1266_s6 = smov [#allocation5]  }
  0x3b   : > { %p1134_p0 = pnand %p1132_p13, %p1120_p2  ;;  %s1136_s1 = sshll.u32 %s1266_s6, 4  ;;  %s1137_s1 = int_to_ptr.vmem [resolvable:$false] %s1136_s1 }
  0x3c   : > { %s1138_s11 = scalar_lea.vmem %s1137_s1, 128  ;;  %p1139_p10 = scmp.lt.s32.totalorder %s242_s17, %s1137_s1 }
  0x3d   : > { %p1135_p5 = pneg %p1134_p0  ;;  %p1140_p1 = scmp.lt.s32.totalorder %s1138_s11, %s1131_s8 }
  0x3f   : > { %p1141_p4 = por %p1140_p1, %p1139_p10 }
  0x41   : > { %p1142_p6 = pnand %p1141_p4, %p1135_p5 }
  0x43   : > { %1145 = shalt.err (!%p1142_p6)
}
  0x44   : > { %977 = dma.hbm_to_vmem [thread:$0]  (!%p1418_p11), %s239_s15, 64, %s242_s17, %s231_s24  }
  0x45   : > { %250 = sbr.rel (%p1361_p8) target bundleno = 1558 (0x616), region = 36  ;;  %s1429_s9 = sand.u32 (!%p1361_p8), 1, %s1244_s19  }
  0x46   : > { %s869_s10 = sshll.u32 (!%p1361_p8), %s1429_s9, 2  ;;  %s253_s13 = scalar_lea.sflag (!%p1361_p8), [#allocation6], %s1429_s9 }
  0x47   : > { %s256_s14 = scalar_lea.vmem (!%p1361_p8), [#allocation5], %s869_s10  ;;  %p1597_p12 = scmp.ne.s32.totalorder (!%p1361_p8), %s1590_s28, 0 }
  0x4a   : > { %1223 = dma.done.wait (%p1597_p12), %s253_s13, 64  }
  0x4b   : > { %1225 = vsyncadd (%p1597_p12), %s253_s13, 4294967232  ;;  %p1598_p3 = scmp.ne.s32.totalorder %s1588_s26, 0 }
  0x4d   : > { %1227 = dma.done.wait (%p1598_p3), [#allocation9], 512  }
  0x4e   : > { %1229 = vsyncadd (%p1598_p3), [#allocation9], 4294966784  ;;  %v1267_v0 = vmov 0.0   ;;  %vm1268_vm0 = vmmov 0   ;;  %v1051_v1 = vld [vmem:[#allocation8 + $0x8] sm:$0xff]   ;;  %v1052_v2 = vld [vmem:[#allocation8] sm:$0xff]  }
  0x4f   : > { %913 = vmatprep.subr.bf16.mxu0 %v1267_v0  ;;  %917 = vmatprep.mubr.msk.bf16.mxu0 %vm1268_vm0, %v1267_v0  ;;  %v301_v3 = vld [vmem:[%s256_s14] sm:$0xf]  ;;  %vm318_vm1 = vcmask 261120   ;;  %vm364_vm2 = vcmask 257024   ;;  %s1269_s1 = smov 96   ;;  %s1270_s26 = smov 112  }
  0x50   : > { %921 = vmatprep.subr.bf16.mxu1 %v1267_v0  ;;  %923 = vmatprep.mubr.msk.bf16.mxu1 %vm1268_vm0, %v1267_v0  ;;  %vm386_vm3 = vcmask 130048   ;;  %vm433_vm4 = vcmask 64512   ;;  %s1271_s28 = smov 64   ;;  %vm450_vm5 = vcmask 1043456   ;;  %s873_s30 = sshll.u32 %s1429_s9, 4  ;;  %v1056_v54 = vld [vmem:[#allocation10 + $0x8] sm:$0xff]  }
  0x51   : > { %914 = vmatpush3.bf16.msra.mxu0 %v1051_v1  ;;  %s1475_s15 = scalar_lea.vmem [#allocation12], %s873_s30  ;;  %v1057_v59 = vld [vmem:[#allocation10] sm:$0xff]   ;;  %s1272_s16 = smov 16  }
  0x52   : > { %915 = vmatprep.subr.bf16.mxu0 %v1267_v0  ;;  %s898_s17 = sshll.u32 %s1252_s21, 8  ;;  %s723_s27 = sshll.u32 %s1475_s15, 4  ;;  %s1496_s27 = int_to_ptr.vmem [resolvable:$true] %s723_s27 }
  0x53   : > { %s1494_s6 = scalar_lea.hbm %s1583_s5, %s898_s17  ;;  %s695_s11 = scalar_lea.sflag [#allocation13], %s1429_s9 }
  0x54   : > { %s1146_s10 = scalar_lea.vmem %s1496_s27, 256  ;;  %s1273_s13 = smov [#allocation12]  }
  0x55   : > { %916 = vmatpush3.bf16.msra.mxu0 %v1052_v2  ;;  %p1147_p8 = scmp.ne.s32.totalorder %s1496_s27, %s1146_s10  ;;  %s1150_s14 = sshll.u32 %s1273_s13, 4  ;;  %s1151_s14 = int_to_ptr.vmem [resolvable:$false] %s1150_s14 }
  0x56   : > { %927 = vmatprep.subr.bf16.mxu0 %v1267_v0  ;;  %p1153_p2 = scmp.lt.s32.totalorder %s1496_s27, %s1151_s14 }
  0x57   : > { %p1148_p9 = pnand %p1147_p8, %p1402_p7 }
  0x58   : > { %918 = vmatmul.mubr.msk.bf16.vlgmr.msra.gmra.mxu0 %vm318_vm1, %v301_v3 }
  0x59   : > { %929 = vmatprep.mubr.msk.bf16.mxu0 %vm1268_vm0, %v1267_v0  ;;  %p1149_p11 = pneg %p1148_p9 }
 0x118   : > { %v356_v4 = vpop.f32.mrf.mxu0 }
 0x119   : > { %v362_v5 = vmul.f32 0.25, %v356_v4  ;;  %v897_v6 = vpack.c.bf16 %v356_v4, %v356_v4 }
 0x11a   : > { %v919_v7 = vpop.f32.mrf.mxu0 }
 0x11b   : > { %v363_v8 = vpack.c.bf16 %v362_v5, %v362_v5  ;;  %370 = vrot.lane.b32.xlu0 %v897_v6, %s1269_s1  ;;  %s1152_s1 = scalar_lea.vmem %s1151_s14, 512 }
 0x11c   : > { %v359_v9 = vpop.f32.mrf.mxu0  ;;  %p1154_p13 = scmp.lt.s32.totalorder %s1152_s1, %s1146_s10 }
 0x11d   : > { %365 = vst.msk [vmem:[#allocation2] sm:$0xf] %vm364_vm2, %v363_v8 }
 0x11e   : > { %v920_v10 = vpop.f32.mrf.mxu0  ;;  %p1155_p0 = por %p1154_p13, %p1153_p2 }
 0x120   : > { %p1156_p5 = pnand %p1155_p0, %p1149_p11 }
 0x124   : > { %v383_v11 = vld [vmem:[#allocation2] sm:$0xf] }
 0x125   : > { %v880_v12 = vcombine.low %v383_v11, %v383_v11 }
 0x127   : > { %497 = vrot.lane.b32.xlu1 %v880_v12, %s1270_s26 }
 0x18d   : > { %v371_v13 = vpop.permute.xlu0 %370 }
 0x18e   : > { %373 = vst.msk [vmem:[#allocation3] sm:$0xf] %vm364_vm2, %v371_v13 }
 0x195   : > { %v384_v14 = vld [vmem:[#allocation3] sm:$0xf] }
 0x196   : > { %v391_v15 = vsel %vm386_vm3, %v384_v14, 0  ;;  %v881_v16 = vcombine.low %v384_v14, %v384_v14 }
 0x197   : > { %922 = vmatpush3.bf16.xpose.msra.mxu1 %v391_v15 }
 0x198   : > { %502 = vrot.lane.b32.xlu0 %v881_v16, %s1270_s26  ;;  %933 = vmatprep.subr.bf16.mxu1 %v1267_v0 }
 0x199   : > { %v498_v19 = vpop.permute.xlu1 %497 }
 0x19e   : > { %924 = vmatmul.mubr.msk.bf16.vlgmr.msra.gmra.mxu1 %vm386_vm3, %v383_v11 }
 0x19f   : > { %935 = vmatprep.mubr.msk.bf16.mxu1 %vm1268_vm0, %v1267_v0 }
 0x20a   : > { %v503_v17 = vpop.permute.xlu0 %502 }
 0x20b   : > { %v508_v18 = vsel %vm386_vm3, %v503_v17, 0 }
 0x20c   : > { %934 = vmatpush3.bf16.xpose.msra.mxu1 %v508_v18 }
 0x20d   : > { %945 = vmatprep.subr.bf16.mxu1 %v1267_v0 }
 0x213   : > { %936 = vmatmul.mubr.msk.bf16.vlgmr.msra.gmra.mxu1 %vm386_vm3, %v498_v19 }
 0x214   : > { %949 = vmatprep.mubr.msk.bf16.mxu1 %vm1268_vm0, %v1267_v0  ;;  %946 = vmatpush3.bf16.msra.mxu1 %v1056_v54 }
 0x215   : > { %947 = vmatprep.subr.bf16.mxu1 %v1267_v0 }
 0x218   : > { %948 = vmatpush3.bf16.msra.mxu1 %v1057_v59 }
 0x25e   : > { %v427_v20 = vpop.f32.mrf.mxu1 }
 0x25f   : > { %v434_v21 = vsel %vm433_vm4, %v427_v20, -inf }
 0x260   : > { %435 = vmax.xlane.f32.xlu1 %v434_v21  ;;  %v925_v22 = vpop.f32.mrf.mxu1 }
 0x262   : > { %v430_v23 = vpop.f32.mrf.mxu1 }
 0x264   : > { %v926_v24 = vpop.f32.mrf.mxu1 }
 0x2d3   : > { %v544_v25 = vpop.f32.mrf.mxu1 }
 0x2d4   : > { %v550_v26 = vsel %vm433_vm4, %v544_v25, -inf }
 0x2d5   : > { %551 = vmax.xlane.f32.xlu0 %v550_v26  ;;  %v937_v27 = vpop.f32.mrf.mxu1 }
 0x2d7   : > { %v547_v28 = vpop.f32.mrf.mxu1 }
 0x2d9   : > { %v938_v29 = vpop.f32.mrf.mxu1 }
 0x2e9   : > { %v436_v30 = vpop.xlane.xlu1 %435 }
 0x2ea   : > { %v437_v31 = vsub.f32 %v427_v20, %v436_v30 }
 0x2eb   : > { %374 = vrot.lane.b32.xlu0 %v897_v6, %s1271_s28 }
 0x2ec   : > { %v438_v32 = vmul.f32 1.442695, %v437_v31 }
 0x2ee   : > { %1058 = vpow2.f32 %v438_v32 }
 0x2fb   : > { %v1059_v33 = vpop.eup %1058 }
 0x2fc   : > { %v440_v34 = vsel %vm433_vm4, %v1059_v33, 0.0 }
 0x2fd   : > { %441 = vadd.xlane.f32.xlu1 %v440_v34 }
 0x35e   : > { %v552_v35 = vpop.xlane.xlu0 %551 }
 0x35f   : > { %v553_v36 = vsub.f32 %v544_v25, %v552_v35 }
 0x361   : > { %v554_v37 = vmul.f32 1.442695, %v553_v36 }
 0x362   : > { %v375_v38 = vpop.permute.xlu0 %374 }
 0x363   : > { %1060 = vpow2.f32 %v554_v37  ;;  %377 = vst.msk [vmem:[#allocation4] sm:$0xf] %vm364_vm2, %v375_v38 }
 0x36a   : > { %v385_v39 = vld [vmem:[#allocation4] sm:$0xf] }
 0x36b   : > { %v452_v40 = vsel %vm450_vm5, %v385_v39, 0  ;;  %v884_v43 = vcombine.low %v385_v39, %v385_v39 }
 0x36c   : > { %928 = vmatpush3.bf16.msra.mxu0 %v452_v40 }
 0x36d   : > { %939 = vmatprep.subr.bf16.mxu0 %v1267_v0 }
 0x370   : > { %v1061_v41 = vpop.eup %1060 }
 0x371   : > { %v556_v42 = vsel %vm433_vm4, %v1061_v41, 0.0 }
 0x372   : > { %557 = vadd.xlane.f32.xlu1 %v556_v42 }
 0x383   : > { %567 = vrot.lane.b32.xlu1 %v884_v43, %s1270_s26 }
 0x386   : > { %v442_v44 = vpop.xlane.xlu1 %441 }
 0x387   : > { %1062 = vrcp.f32 %v442_v44 }
 0x394   : > { %v1063_v45 = vpop.eup %1062 }
 0x395   : > { %v444_v46 = vmul.f32 %v1063_v45, %v1059_v33 }
 0x397   : > { %v446_v47 = vpack.c.bf16 %v444_v46, %v444_v46  ;;  %445 = vst.msk [vmem:[%s1475_s15] sm:$0xff] %vm433_vm4, %v444_v46 }
 0x399   : > { %930 = vmatmul.mubr.msk.bf16.vlgmr.msra.gmra.mxu0 %vm433_vm4, %v446_v47 }
 0x39a   : > { %941 = vmatprep.mubr.msk.bf16.mxu0 %vm1268_vm0, %v1267_v0 }
 0x3fb   : > { %v558_v48 = vpop.xlane.xlu1 %557 }
 0x3fc   : > { %1064 = vrcp.f32 %v558_v48 }
 0x3ff   : > { %v568_v49 = vpop.permute.xlu1 %567 }
 0x400   : > { %v573_v50 = vsel %vm450_vm5, %v568_v49, 0 }
 0x401   : > { %940 = vmatpush3.bf16.msra.mxu0 %v573_v50 }
 0x409   : > { %v1065_v51 = vpop.eup %1064 }
 0x40a   : > { %v560_v52 = vmul.f32 %v1065_v51, %v1061_v41 }
 0x40c   : > { %v563_v53 = vpack.c.bf16 %v560_v52, %v560_v52  ;;  %883 = vst.msk [vmem:[%s1475_s15 + $0x8] sm:$0xff] %vm433_vm4, %v560_v52 }
 0x40e   : > { %942 = vmatmul.mubr.msk.bf16.vlgmr.msra.gmra.mxu0 %vm433_vm4, %v563_v53 }
 0x459   : > { %v488_v55 = vpop.f32.mrf.mxu0 }
 0x45b   : > { %v931_v56 = vpop.f32.mrf.mxu0 }
 0x45d   : > { %v491_v57 = vpop.f32.mrf.mxu0 }
 0x45f   : > { %v932_v58 = vpop.f32.mrf.mxu0 }
 0x4ce   : > { %v609_v60 = vpop.f32.mrf.mxu0 }
 0x4cf   : > { %616 = vrot.lane.b32.xlu0 %v609_v60, %s1272_s16 }
 0x4d0   : > { %v943_v61 = vpop.f32.mrf.mxu0 }
 0x4d2   : > { %v612_v62 = vpop.f32.mrf.mxu0 }
 0x4d4   : > { %v944_v63 = vpop.f32.mrf.mxu0 }
 0x541   : > { %v617_v1 = vpop.permute.xlu0 %616 }
 0x542   : > { %v619_v2 = vsel %vm386_vm3, %v488_v55, %v617_v1 }
 0x543   : > { %v620_v0 = vpack.c.bf16 %v619_v2, %v619_v2 }
 0x545   : > { %950 = vmatmul.mubr.msk.bf16.vlgmr.msra.gmra.mxu1 %vm318_vm1, %v620_v0 }
 0x546   : > { %1159 = shalt.err (!%p1156_p5)
}
 0x547   : > { %s1160_s26 = scalar_lea.hbm %s1494_s6, 256  ;;  %s1164_s15 = scalar_lea.hbm %s1583_s5, 512 }
 0x548   : > { %p1161_p10 = scmp.ne.s32.totalorder %s1494_s6, %s1160_s26  ;;  %p1165_p6 = scmp.lt.s32.totalorder %s1494_s6, %s1583_s5 }
 0x549   : > { %p1166_p12 = scmp.lt.s32.totalorder %s1164_s15, %s1160_s26 }
 0x54a   : > { %p1162_p1 = pnand %p1161_p10, %p1402_p7 }
 0x54b   : > { %p1167_p3 = por %p1166_p12, %p1165_p6 }
 0x54c   : > { %p1163_p4 = pneg %p1162_p1 }
 0x54e   : > { %p1168_p8 = pnand %p1167_p3, %p1163_p4 }
 0x550   : > { %1171 = shalt.err (!%p1168_p8)
}
 0x551   : > { %s1274_s24 = smov 128   ;;  %s1275_s8 = smov 8   ;;  %v886_v3 = vld [vmem:[%s1581_s3] ss:$0 sm:$0xff] }
 0x552   : > { %964 = dma.vmem_to_hbm [thread:$0]  (%p1402_p7), %s1496_s27, 256, %s1494_s6, %s695_s11, %s1274_s24, %s1274_s24, %s1275_s8  }
 0x553   : > { %s872_s10 = sshll.u32 %s1429_s9, 3  ;;  %s892_s1 = sshll.u32 %s1252_s21, 7 }
 0x554   : > { %s288_s26 = scalar_lea.vmem [#allocation11], %s872_s10  ;;  %s1529_s16 = scalar_lea.hbm %s1582_s4, %s892_s1 }
 0x555   : > { %s709_s28 = sshll.u32 %s288_s26, 4  ;;  %s690_s27 = scalar_lea.sflag [#allocation7], %s1429_s9  ;;  %s1531_s28 = int_to_ptr.vmem [resolvable:$true] %s709_s28 }
 0x556   : > { %s1172_s21 = scalar_lea.vmem %s1531_s28, 128  ;;  %s1276_s6 = smov [#allocation11]  }
 0x557   : > { %p1173_p9 = scmp.ne.s32.totalorder %s1531_s28, %s1172_s21  ;;  %s1176_s11 = sshll.u32 %s1276_s6, 4  ;;  %s1177_s11 = int_to_ptr.vmem [resolvable:$false] %s1176_s11 }
 0x558   : > { %s1178_s17 = scalar_lea.vmem %s1177_s11, 256  ;;  %p1179_p13 = scmp.lt.s32.totalorder %s1531_s28, %s1177_s11 }
 0x559   : > { %p1174_p11 = pnand %p1173_p9, %p1402_p7  ;;  %p1180_p0 = scmp.lt.s32.totalorder %s1178_s17, %s1172_s21 }
 0x55b   : > { %p1175_p2 = pneg %p1174_p11  ;;  %p1181_p5 = por %p1180_p0, %p1179_p13 }
 0x55d   : > { %p1182_p10 = pnand %p1181_p5, %p1175_p2 }
 0x605   : > { %v682_v4 = vpop.f32.mrf.mxu1 }
 0x606   : > { %v683_v5 = vadd.f32 %v886_v3, %v682_v4 }
 0x607   : > { %v951_v6 = vpop.f32.mrf.mxu1 }
 0x608   : > { %688 = vst.msk [vmem:[%s288_s26] sm:$0xff] %vm318_vm1, %v683_v5 }
 0x609   : > { %v685_v7 = vpop.f32.mrf.mxu1 }
 0x60a   : > { %1185 = shalt.err (!%p1182_p10)
}
 0x60b   : > { %s1186_s24 = scalar_lea.hbm %s1529_s16, 128  ;;  %s1190_s10 = scalar_lea.hbm %s1582_s4, 256 }
 0x60c   : > { %p1187_p1 = scmp.ne.s32.totalorder %s1529_s16, %s1186_s24  ;;  %p1191_p12 = scmp.lt.s32.totalorder %s1529_s16, %s1582_s4 }
 0x60d   : > { %p1192_p3 = scmp.lt.s32.totalorder %s1190_s10, %s1186_s24 }
 0x60e   : > { %p1188_p4 = pnand %p1187_p1, %p1402_p7 }
 0x60f   : > { %p1193_p8 = por %p1192_p3, %p1191_p12 }
 0x610   : > { %p1189_p6 = pneg %p1188_p4 }
 0x612   : > { %p1194_p9 = pnand %p1193_p8, %p1189_p6 }
 0x614   : > { %1197 = shalt.err (!%p1194_p9)
}
 0x615   : > { %963 = dma.vmem_to_hbm [thread:$0]  (%p1402_p7), %s1531_s28, 128, %s1529_s16, %s690_s27   ;;  %v952_v8 = vpop.f32.mrf.mxu1 }
 0x616 PF: > { %s738_s1 = sand.u32 1, %s1240_s18   ;;  %p1599_p11 = scmp.ne.s32.totalorder %s1591_s29, 0 }
 0x617   : > { %p1600_p2 = scmp.ge.s32.totalorder %s1260_s23, 2  ;;  %s739_s26 = scalar_lea.sflag [#allocation7], %s738_s1 }
 0x619   : > { %p979_p13 = pnand %p1600_p2, %p1599_p11 }
 0x61b   : > { %p980_p0 = pneg %p979_p13 }
 0x61d   : > { %1231 = dma.done.wait (%p980_p0), %s739_s26, 128  }
 0x61e   : > { %1233 = vsyncadd (%p980_p0), %s739_s26, 4294967168  ;;  %s748_s30 = scalar_lea.sflag [#allocation13], %s738_s1 }
 0x61f   : > { %1235 = dma.done.wait (%p980_p0), %s748_s30, 256  }
 0x620   : > { %1237 = vsyncadd (%p980_p0), %s748_s30, 4294967040  ;;  %s26_s23 = sadd.s32 1, %s1260_s23   ;;  %s1601_s18 = smov %s1244_s19 }
 0x621   : > { %p23_p5 = scmp.ge.s32.totalorder %s26_s23, 4   ;;  %s1602_s19 = smov %s1248_s20 }
 0x622   : > { %s1603_s20 = smov %s1411_s12  ;;  %s1604_s21 = smov %s1256_s22 }
 0x623   : > { %s1605_s22 = smov %s1607_s25  ;;  %25 = sbr.rel (!%p23_p5) target bundleno = 11 (0xb), region = 112 }
 0x628   :  { %753 = vsyncpa [#allocation6], 1 }
 0x629   :  { %755 = vsyncpa [#allocation6 + $0x1], 1 }
 0x62a   :  { %756 = vsyncpa [#allocation9], 1 }
 0x62b   :  { %757 = vsyncpa [#allocation7], 1 }
 0x62c   :  { %759 = vsyncpa [#allocation7 + $0x1], 1 }
 0x62d   :  { %760 = vsyncpa [#allocation13], 1 }
 0x62e   :  { %762 = vsyncpa [#allocation13 + $0x1], 1 }

</bundles_post_ra>
